<compile_context>
chip_gen: v7x
topology: tpu7x:2x2x1
jax: 0.10.0
libtpu: 0.0.40
codegen_flags: <defaults>
</compile_context>

<pallas_src>
import math
from functools import partial

import numpy as np
import jax
import jax.numpy as jnp
from jax.experimental import pallas as pl
from jax.experimental.pallas import tpu as pltpu

# ----------------------- configuration (matches SwinEncoder.__init__) -----------------
EMBED_DIM = 192
DEPTHS = (2, 2, 18, 2)
NUM_HEADS = (6, 12, 24, 48)
WINDOW_SIZE = 7
MLP_RATIO = 4.0
PATCH_SIZE = 4
IN_CHANS = 3
NUM_FEATURES = tuple(int(EMBED_DIM * 2 ** i) for i in range(len(DEPTHS)))
LN_EPS = 1e-5

MAX_TM = 512                       # max rows per grid step (multiple of 8)


def _vmem_capacity_bytes():
    """Physical VMEM of the local chip (128 MiB v5e/v6e, 64 MiB v7x); safe fallback."""
    try:
        info = pltpu.get_tpu_info()
        for name in ("vmem_capacity_bytes", "vmem_bytes", "vmem_size_bytes"):
            v = getattr(info, name, None)
            if isinstance(v, int) and v > 0:
                return v
    except Exception:
        pass
    return 64 * 1024 * 1024        # conservative (v7x-sized) fallback


_VMEM_CAP = _vmem_capacity_bytes()
VMEM_LIMIT = int(min(_VMEM_CAP * 0.80, _VMEM_CAP - 8 * 1024 * 1024))
TILE_BUDGET = int(VMEM_LIMIT * 0.6)     # double-buffered per-call tile footprint target


# ================================ small static helpers =================================
def _round_up(v, m):
    return (v + m - 1) // m * m


def _pick_tm(M):
    """Row tile: near-even split into <=MAX_TM chunks, rounded up to a multiple of 8."""
    nb = -(-M // MAX_TM)
    tm = _round_up(-(-M // nb), 8)
    return tm, _round_up(M, tm)


def _pick_tn(N, K, tm, x_bytes, out_bytes):
    """Output-column tile: full N if the double-buffered tiles fit, else the largest
    256-multiple (then 128-multiple) divisor that fits the budget."""
    def cost(tn):
        return 2 * (tm * K * x_bytes + K * tn * 2 + tn * 4 + tm * tn * out_bytes)
    if N % 128 != 0 or cost(N) <= TILE_BUDGET:
        return N
    for step in (256, 128):
        cands = [d for d in range(step, N, step) if N % d == 0 and cost(d) <= TILE_BUDGET]
        if cands:
            return max(cands)
    return 128


def _pad_rows(x, Mp):
    M = x.shape[0]
    return x if Mp == M else jnp.pad(x, ((0, Mp - M), (0, 0)))


def _cparams(sems):
    return pltpu.CompilerParams(dimension_semantics=sems, vmem_limit_bytes=VMEM_LIMIT)


# ================================ in-kernel math =======================================
_SQRT_HALF = 0.7071067811865476


def _erf_approx(x):
    # Abramowitz & Stegun 7.1.26 rational approximation, |err| <= 1.5e-7 (well below the
    # bf16 matmul noise floor). Uses only VPU/EUP ops that are guaranteed to lower.
    # TODO(synk): exact-erf GELU replaced by this ~1.5e-7-accurate approximation in-kernel.
    a1, a2, a3, a4, a5 = 0.254829592, -0.284496736, 1.421413741, -1.453152027, 1.061405429
    p = 0.3275911
    s = jnp.where(x >= 0.0, 1.0, -1.0)
    z = jnp.abs(x)
    t = 1.0 / (1.0 + p * z)
    poly = ((((a5 * t + a4) * t + a3) * t + a2) * t + a1) * t
    return s * (1.0 - poly * jnp.exp(-z * z))


def _gelu_exact(x):
    return 0.5 * x * (1.0 + _erf_approx(x * _SQRT_HALF))


# ================================ Pallas kernels =======================================
def _linear_kernel(*refs, act, fuse_ln):
    """[optional LayerNorm] -> bf16 matmul (f32 accum) -> +bias -> [optional GELU]."""
    if fuse_ln:
        x_ref, g_ref, bt_ref, w_ref, b_ref, o_ref = refs
        x = x_ref[...].astype(jnp.float32)
        mu = jnp.mean(x, axis=-1, keepdims=True)
        xc = x - mu
        var = jnp.mean(xc * xc, axis=-1, keepdims=True)
        xn = xc * jax.lax.rsqrt(var + LN_EPS) * g_ref[...] + bt_ref[...]
        xb = xn.astype(jnp.bfloat16)
    else:
        x_ref, w_ref, b_ref, o_ref = refs
        xb = x_ref[...]
    acc = jnp.dot(xb, w_ref[...], preferred_element_type=jnp.float32) + b_ref[...]
    if act == "gelu":
        acc = _gelu_exact(acc)
    o_ref[...] = acc.astype(o_ref.dtype)


def pallas_linear(x, w, b, act=None, ln_g=None, ln_b=None, out_dtype=jnp.float32):
    """x:(M,K) @ w:(K,N) + b:(N,). Grid tiles M and N (both parallel), K kept whole.
    Activations always shipped bf16 (LN stats recomputed in f32 in-kernel)."""
    M, K = x.shape
    N = w.shape[1]
    fuse_ln = ln_g is not None
    out_bytes = 2 if out_dtype == jnp.bfloat16 else 4

    tm, Mp = _pick_tm(M)
    tn = _pick_tn(N, K, tm, 2, out_bytes)
    # expose >=2 grid steps so both v7x TensorCores get work on tiny calls
    if (Mp // tm) * (N // tn) == 1 and M >= 16:
        tm = _round_up(-(-M // 2), 8)
        Mp = 2 * tm

    ni, nj = Mp // tm, N // tn
    xin = _pad_rows(x.astype(jnp.bfloat16), Mp)

    # grid ordering: keep the larger of {weight, activation} resident across inner axis
    w_traffic = K * N * 2
    x_traffic = Mp * K * 2
    weight_outer = (ni > 1 and nj > 1 and
                    ni * w_traffic + x_traffic > w_traffic + nj * x_traffic)
    if weight_outer:
        grid = (nj, ni)
        sel = lambda fn: (lambda j, i: fn(i, j))
    else:
        grid = (ni, nj)
        sel = lambda fn: fn

    x_map = sel(lambda i, j: (i, 0))
    p_map = sel(lambda i, j: (0, 0))
    w_map = sel(lambda i, j: (0, j))
    o_map = sel(lambda i, j: (i, j))

    in_specs = [pl.BlockSpec((tm, K), x_map)]
    args = [xin]
    if fuse_ln:
        in_specs += [pl.BlockSpec((1, K), p_map), pl.BlockSpec((1, K), p_map)]
        args += [ln_g.reshape(1, K).astype(jnp.float32),
                 ln_b.reshape(1, K).astype(jnp.float32)]
    in_specs += [pl.BlockSpec((K, tn), w_map), pl.BlockSpec((1, tn), w_map)]
    args += [w.astype(jnp.bfloat16), b.reshape(1, N).astype(jnp.float32)]

    out = pl.pallas_call(
        partial(_linear_kernel, act=act, fuse_ln=fuse_ln),
        out_shape=jax.ShapeDtypeStruct((Mp, N), out_dtype),
        grid=grid,
        in_specs=in_specs,
        out_specs=pl.BlockSpec((tm, tn), o_map),
        compiler_params=_cparams(("parallel", "parallel")),
    )(*args)
    return out[:M] if Mp != M else out


def _layernorm_kernel(x_ref, g_ref, b_ref, o_ref):
    x = x_ref[...]
    mu = jnp.mean(x, axis=-1, keepdims=True)
    xc = x - mu
    var = jnp.mean(xc * xc, axis=-1, keepdims=True)
    o_ref[...] = xc * jax.lax.rsqrt(var + LN_EPS) * g_ref[...] + b_ref[...]


def pallas_layernorm(x, gamma, beta):
    """LayerNorm over the last dim. x:(M,C); grid tiles rows (parallel)."""
    M, C = x.shape
    tm, Mp = _pick_tm(M)
    if Mp // tm == 1 and M >= 16:
        tm = _round_up(-(-M // 2), 8)
        Mp = 2 * tm
    xin = _pad_rows(x.astype(jnp.float32), Mp)
    out = pl.pallas_call(
        _layernorm_kernel,
        out_shape=jax.ShapeDtypeStruct((Mp, C), jnp.float32),
        grid=(Mp // tm,),
        in_specs=[
            pl.BlockSpec((tm, C), lambda i: (i, 0)),
            pl.BlockSpec((1, C), lambda i: (0, 0)),
            pl.BlockSpec((1, C), lambda i: (0, 0)),
        ],
        out_specs=pl.BlockSpec((tm, C), lambda i: (i, 0)),
        compiler_params=_cparams(("parallel",)),
    )(xin, gamma.reshape(1, C).astype(jnp.float32), beta.reshape(1, C).astype(jnp.float32))
    return out[:M] if Mp != M else out


def _window_attn_kernel(*refs, wb, hg, hd, scale, masked):
    """One (window-batch, head-group) step: wb windows x hg heads unrolled.
    Per-head outputs are concatenated and written with ONE lane-dense store per window."""
    if masked:
        q_ref, k_ref, v_ref, bias_ref, mask_ref, o_ref = refs
    else:
        q_ref, k_ref, v_ref, bias_ref, o_ref = refs
    for w in range(wb):
        heads = []
        for h in range(hg):
            sl = slice(h * hd, (h + 1) * hd)
            qh = q_ref[w, :, sl]                       # (N, hd) bf16
            kh = k_ref[w, :, sl]
            vh = v_ref[w, :, sl]
            s = jax.lax.dot_general(qh, kh, (((1,), (1,)), ((), ())),
                                    preferred_element_type=jnp.float32)   # (N, N)
            s = s * scale + bias_ref[h]
            if masked:
                s = s + mask_ref[w]
            s = s - jnp.max(s, axis=-1, keepdims=True)
            p = jnp.exp(s)
            p = p * pl.reciprocal(jnp.sum(p, axis=-1, keepdims=True), approx=True)
            heads.append(jnp.dot(p.astype(jnp.bfloat16), vh,
                                 preferred_element_type=jnp.float32))
        o_ref[w] = jnp.concatenate(heads, axis=-1).astype(o_ref.dtype)


def _head_group(num_heads, head_dim, C):
    """Largest head group <=4 whose channel width is lane-dense (multiple of 128 or C)."""
    cands = [g for g in range(1, num_heads + 1)
             if num_heads % g == 0 and ((g * head_dim) % 128 == 0 or g * head_dim == C)]
    small = [g for g in cands if g <= 4]
    return max(small) if small else min(cands)


def _pick_wb(BnW, nW, masked, cap):
    """Windows per grid step; must divide BnW (and nW when masked, so masks tile)."""
    base = nW if masked else BnW
    for wb in range(max(1, min(cap, base)), 0, -1):
        if base % wb == 0 and BnW % wb == 0:
            return wb
    return 1


def pallas_window_attention(q, k, v, rel_bias, mask, nW):
    """q,k,v:(B*nW, N, C) bf16; rel_bias:(nH,N,N); mask:(nW,N,N) or None -> (B*nW,N,C) bf16."""
    BnW, N, C = q.shape
    nH = rel_bias.shape[0]
    hd = C // nH
    hg = _head_group(nH, hd, C)
    ng = nH // hg
    cb = hg * hd
    scale = float(hd) ** -0.5
    masked = mask is not None
    wb = _pick_wb(BnW, nW, masked, cap=max(1, 32 // hg))

    blk = pl.BlockSpec((wb, N, cb), lambda i, g: (i, 0, g))
    in_specs = [blk, blk, blk, pl.BlockSpec((hg, N, N), lambda i, g: (g, 0, 0))]
    args = [q.astype(jnp.bfloat16), k.astype(jnp.bfloat16), v.astype(jnp.bfloat16),
            rel_bias.astype(jnp.float32)]
    if masked:
        nmb = nW // wb
        in_specs.append(pl.BlockSpec((wb, N, N), lambda i, g: (i % nmb, 0, 0)))
        args.append(mask.astype(jnp.float32))

    return pl.pallas_call(
        partial(_window_attn_kernel, wb=wb, hg=hg, hd=hd, scale=scale, masked=masked),
        out_shape=jax.ShapeDtypeStruct((BnW, N, C), jnp.bfloat16),
        grid=(BnW // wb, ng),
        in_specs=in_specs,
        out_specs=pl.BlockSpec((wb, N, cb), lambda i, g: (i, 0, g)),
        compiler_params=_cparams(("parallel", "parallel")),
    )(*args)


# ================================ static swin helpers ==================================
def _relative_position_index(ws):
    coords = np.stack(np.meshgrid(np.arange(ws), np.arange(ws), indexing="ij"))
    coords_flat = coords.reshape(2, -1)
    rel = coords_flat[:, :, None] - coords_flat[:, None, :]
    rel = rel.transpose(1, 2, 0).astype(np.int64)
    rel[:, :, 0] += ws - 1
    rel[:, :, 1] += ws - 1
    rel[:, :, 0] *= 2 * ws - 1
    return rel.sum(-1)  # (ws*ws, ws*ws)


REL_POS_INDEX = _relative_position_index(WINDOW_SIZE)


def _shifted_attn_mask(Hp, Wp, ws, shift):
    img_mask = np.zeros((1, Hp, Wp, 1), np.float32)
    slices = (slice(0, -ws), slice(-ws, -shift), slice(-shift, None))
    cnt = 0
    for hs in slices:
        for ws_ in slices:
            img_mask[:, hs, ws_, :] = cnt
            cnt += 1
    mw = img_mask.reshape(1, Hp // ws, ws, Wp // ws, ws, 1)
    mw = mw.transpose(0, 1, 3, 2, 4, 5).reshape(-1, ws * ws)
    am = mw[:, None, :] - mw[:, :, None]
    am = np.where(am != 0, -100.0, 0.0).astype(np.float32)
    return jnp.asarray(am)  # (nW, N, N)


def _window_partition(x, ws):
    B, H, W, C = x.shape
    x = x.reshape(B, H // ws, ws, W // ws, ws, C)
    return x.transpose(0, 1, 3, 2, 4, 5).reshape(-1, ws * ws, C)


def _window_reverse(win, ws, B, Hp, Wp):
    C = win.shape[-1]
    x = win.reshape(B, Hp // ws, Wp // ws, ws, ws, C)
    return x.transpose(0, 1, 3, 2, 4, 5).reshape(B, Hp, Wp, C)


# ================================ model blocks =========================================
def swin_block(x, H, W, p, num_heads, shift, attn_mask):
    del num_heads  # head count is implied by rel_bias
    B, L, C = x.shape
    ws = WINDOW_SIZE
    shortcut = x

    # fused norm1 + qkv projection, computed only on the B*L real tokens (one launch)
    qkv = pallas_linear(x.reshape(B * L, C), p["qkv_w"], p["qkv_b"],
                        ln_g=p["norm1_g"], ln_b=p["norm1_b"], out_dtype=jnp.bfloat16)
    qkv = qkv.reshape(B, H, W, 3 * C)

    pad_r = (ws - W % ws) % ws
    pad_b = (ws - H % ws) % ws
    Hp, Wp = H + pad_b, W + pad_r
    if pad_r or pad_b:
        qkv = jnp.pad(qkv, ((0, 0), (0, pad_b), (0, pad_r), (0, 0)))
        # padded tokens carry the qkv bias: parity with PyTorch, which zero-pads the
        # normalized tokens BEFORE the qkv projection (0 @ W + b == b)
        valid = (jnp.arange(Hp) < H)[:, None] & (jnp.arange(Wp) < W)[None, :]
        qkv = jnp.where(valid[None, :, :, None], qkv, p["qkv_b"].astype(jnp.bfloat16))
    nW = (Hp // ws) * (Wp // ws)

    if shift > 0:
        qkv = jnp.roll(qkv, shift=(-shift, -shift), axis=(1, 2))
        mask = attn_mask
    else:
        mask = None

    qkv_win = _window_partition(qkv, ws)                    # (B*nW, N, 3C)
    q = qkv_win[..., :C]
    k = qkv_win[..., C:2 * C]
    v = qkv_win[..., 2 * C:]
    attn_out = pallas_window_attention(q, k, v, p["rel_bias"], mask, nW)   # bf16

    xw = _window_reverse(attn_out, ws, B, Hp, Wp)
    if shift > 0:
        xw = jnp.roll(xw, shift=(shift, shift), axis=(1, 2))
    if pad_r or pad_b:
        xw = xw[:, :H, :W, :]
    # output projection only on the real tokens (padded window rows are discarded above)
    proj = pallas_linear(xw.reshape(B * L, C), p["proj_w"], p["proj_b"])
    x = shortcut + proj.reshape(B, L, C)            # drop_path = identity at inference

    # MLP: norm2 + fc1 + GELU fused in one kernel, then fc2
    h = pallas_linear(x.reshape(B * L, C), p["fc1_w"], p["fc1_b"], act="gelu",
                      ln_g=p["norm2_g"], ln_b=p["norm2_b"], out_dtype=jnp.bfloat16)
    h = pallas_linear(h, p["fc2_w"], p["fc2_b"])
    x = x + h.reshape(B, L, C)
    return x


def patch_merging(x, H, W, p):
    B, L, C = x.shape
    x = x.reshape(B, H, W, C)
    if (H % 2 == 1) or (W % 2 == 1):
        x = jnp.pad(x, ((0, 0), (0, H % 2), (0, W % 2), (0, 0)))
    x0 = x[:, 0::2, 0::2, :]
    x1 = x[:, 1::2, 0::2, :]
    x2 = x[:, 0::2, 1::2, :]
    x3 = x[:, 1::2, 1::2, :]
    x = jnp.concatenate([x0, x1, x2, x3], axis=-1)
    Hh, Wh = (H + 1) // 2, (W + 1) // 2
    x = x.reshape(B * Hh * Wh, 4 * C)
    # norm + reduction fused into one kernel (LayerNorm prologue)
    x = pallas_linear(x, p["reduction_w"], p["reduction_b"],
                      ln_g=p["norm_g"], ln_b=p["norm_b"])
    return x.reshape(B, Hh * Wh, 2 * C)


def _patch_embed(pe, x_nchw):
    B, Cin, H, W = x_nchw.shape
    ps = PATCH_SIZE
    pad_h = (ps - H % ps) % ps
    pad_w = (ps - W % ps) % ps
    x = x_nchw
    if pad_h or pad_w:
        x = jnp.pad(x, ((0, 0), (0, 0), (0, pad_h), (0, pad_w)))
    Hp, Wp = H + pad_h, W + pad_w
    Wh, Ww = Hp // ps, Wp // ps
    # 4x4/stride-4 conv expressed as a matmul over flattened patches
    xp = x.reshape(B, Cin, Wh, ps, Ww, ps).transpose(0, 2, 4, 1, 3, 5)
    xp = xp.reshape(B * Wh * Ww, Cin * ps * ps)
    xe = pallas_linear(xp, pe["w"], pe["b"])
    xe = pallas_layernorm(xe, pe["norm_g"], pe["norm_b"])
    return xe.reshape(B, Wh * Ww, EMBED_DIM)


def _out_norm(x_out, g, b, Ho, Wo):
    B, L, C = x_out.shape
    xo = pallas_layernorm(x_out.reshape(B * L, C), g, b)
    return xo.reshape(B, Ho, Wo, C).transpose(0, 3, 1, 2)     # -> NCHW


# jitted entry points (glue fuses in XLA; identical blocks share one compilation)
_swin_block_jit = jax.jit(swin_block, static_argnums=(1, 2, 4, 5))
_patch_merging_jit = jax.jit(patch_merging, static_argnums=(1, 2))
_patch_embed_jit = jax.jit(_patch_embed)
_out_norm_jit = jax.jit(_out_norm, static_argnums=(3, 4))


def basic_layer(x, H, W, p, num_heads):
    ws = WINDOW_SIZE
    shift = ws // 2
    Hp = int(math.ceil(H / ws)) * ws
    Wp = int(math.ceil(W / ws)) * ws
    attn_mask = _shifted_attn_mask(Hp, Wp, ws, shift)
    for d, blk in enumerate(p["blocks"]):
        blk_shift = 0 if d % 2 == 0 else shift
        x = _swin_block_jit(x, H, W, blk, num_heads, blk_shift,
                            attn_mask if blk_shift > 0 else None)
    if "downsample" in p:
        x_down = _patch_merging_jit(x, H, W, p["downsample"])
        return x, H, W, x_down, (H + 1) // 2, (W + 1) // 2
    return x, H, W, x, H, W


def swin_encoder_forward(params, x_nchw):
    B, Cin, H, W = x_nchw.shape
    ps = PATCH_SIZE
    Wh, Ww = (H + ps - 1) // ps, (W + ps - 1) // ps
    x = _patch_embed_jit(params["patch_embed"], x_nchw)

    outs = []
    Hc, Wc = Wh, Ww
    for i in range(len(DEPTHS)):
        x_out, Ho, Wo, x, Hc, Wc = basic_layer(x, Hc, Wc, params["layers"][i], NUM_HEADS[i])
        on = params["out_norms"][i]
        outs.append(_out_norm_jit(x_out, on["g"], on["b"], Ho, Wo))
    return tuple(outs)


# ================================ parameter init =======================================
class _KeyGen:
    def __init__(self, seed):
        self._key = jax.random.PRNGKey(seed)

    def __call__(self):
        self._key, sub = jax.random.split(self._key)
        return sub


def _init_w(key, shape, std=0.02, dtype=jnp.bfloat16):
    # TODO(synk): checkpoint load (torch.load of .pth) replaced by synthetic trunc-normal-like init.
    return (std * jax.random.normal(key, shape, jnp.float32)).astype(dtype)


def init_params(seed=42):
    kg = _KeyGen(seed)
    ws = WINDOW_SIZE
    N = ws * ws
    params = {
        "patch_embed": dict(
            w=_init_w(kg(), (IN_CHANS * PATCH_SIZE * PATCH_SIZE, EMBED_DIM)),
            b=jnp.zeros((EMBED_DIM,), jnp.float32),
            norm_g=jnp.ones((EMBED_DIM,), jnp.float32),
            norm_b=jnp.zeros((EMBED_DIM,), jnp.float32),
        )
    }
    layers = []
    rel_idx = jnp.asarray(REL_POS_INDEX.reshape(-1))
    for i, (depth, nH) in enumerate(zip(DEPTHS, NUM_HEADS)):
        C = NUM_FEATURES[i]
        hidden = int(C * MLP_RATIO)
        blocks = []
        for _ in range(depth):
            rpb = _init_w(kg(), ((2 * ws - 1) ** 2, nH), dtype=jnp.float32)
            # relative-position bias gathered/transposed once here (not per forward)
            rel_bias = rpb[rel_idx].reshape(N, N, nH).transpose(2, 0, 1)
            blocks.append(
                dict(
                    norm1_g=jnp.ones((C,), jnp.float32),
                    norm1_b=jnp.zeros((C,), jnp.float32),
                    # fused qkv: columns ordered [q | k | v]
                    qkv_w=_init_w(kg(), (C, 3 * C)),
                    qkv_b=jnp.zeros((3 * C,), jnp.float32),
                    rel_bias=rel_bias,
                    proj_w=_init_w(kg(), (C, C)),
                    proj_b=jnp.zeros((C,), jnp.float32),
                    norm2_g=jnp.ones((C,), jnp.float32),
                    norm2_b=jnp.zeros((C,), jnp.float32),
                    fc1_w=_init_w(kg(), (C, hidden)),
                    fc1_b=jnp.zeros((hidden,), jnp.float32),
                    fc2_w=_init_w(kg(), (hidden, C)),
                    fc2_b=jnp.zeros((C,), jnp.float32),
                )
            )
        layer = dict(blocks=blocks)
        if i < len(DEPTHS) - 1:
            layer["downsample"] = dict(
                norm_g=jnp.ones((4 * C,), jnp.float32),
                norm_b=jnp.zeros((4 * C,), jnp.float32),
                reduction_w=_init_w(kg(), (4 * C, 2 * C)),
                reduction_b=jnp.zeros((2 * C,), jnp.float32),
            )
        layers.append(layer)
    params["layers"] = layers
    params["out_norms"] = [
        dict(g=jnp.ones((NUM_FEATURES[i],), jnp.float32),
             b=jnp.zeros((NUM_FEATURES[i],), jnp.float32))
        for i in range(len(DEPTHS))
    ]
    return params


# ======================================= main ==========================================
if __name__ == "__main__":
    params = init_params(seed=42)
    x = jax.random.normal(jax.random.PRNGKey(0), (2, IN_CHANS, 32, 32), jnp.float32)

    feats = swin_encoder_forward(params, x)
    feats = jax.block_until_ready(feats)

    expected = tuple(
        (2, NUM_FEATURES[i], 32 // PATCH_SIZE // (2 ** i), 32 // PATCH_SIZE // (2 ** i))
        for i in range(len(DEPTHS))
    )
    assert tuple(f.shape for f in feats) == expected, (tuple(f.shape for f in feats), expected)
    assert all(bool(jnp.all(jnp.isfinite(f.astype(jnp.float32)))) for f in feats)
    print("KERNEL_OK")
</pallas_src>

<mosaic_0001>
module attributes {stable_mosaic.version = 11 : i64} {
  func.func @_linear_kernel(%arg0: i32, %arg1: i32, %arg2: memref<64x48xbf16, #tpu.memory_space<vmem>>, %arg3: memref<48x192xbf16, #tpu.memory_space<vmem>>, %arg4: memref<1x192xf32, #tpu.memory_space<vmem>>, %arg5: memref<64x192xf32, #tpu.memory_space<vmem>>) attributes {dimension_semantics = [#tpu.dimension_semantics<parallel>, #tpu.dimension_semantics<parallel>], iteration_bounds = array<i64: 2, 1>, scalar_prefetch = 0 : i64, scratch_operands = 0 : i64, tpu.core_type = #tpu.core_type<tc>, window_params = [{transform_indices = @transform_0, window_bounds = array<i64: 64, 48>}, {transform_indices = @transform_1, window_bounds = array<i64: 48, 192>}, {transform_indices = @transform_2, window_bounds = array<i64: 1, 192>}, {transform_indices = @transform_3, window_bounds = array<i64: 64, 192>}]} {
    %c0 = arith.constant 0 : index
    %c0_0 = arith.constant 0 : index
    %0 = vector.load %arg2[%c0, %c0_0] : memref<64x48xbf16, #tpu.memory_space<vmem>>, vector<64x48xbf16>
    %c0_1 = arith.constant 0 : index
    %c0_2 = arith.constant 0 : index
    %1 = vector.load %arg3[%c0_1, %c0_2] : memref<48x192xbf16, #tpu.memory_space<vmem>>, vector<48x192xbf16>
    %cst = arith.constant dense<0.000000e+00> : vector<64x192xf32>
    %2 = tpu.matmul %0, %1, %cst {dimension_numbers = #tpu.dot_dimension_numbers<[1], [0], [0], [1], [0, 0, 1, 1], [], []>} : vector<64x48xbf16>, vector<48x192xbf16>, vector<64x192xf32> -> vector<64x192xf32>
    %c0_3 = arith.constant 0 : index
    %c0_4 = arith.constant 0 : index
    %3 = vector.load %arg4[%c0_3, %c0_4] : memref<1x192xf32, #tpu.memory_space<vmem>>, vector<1x192xf32>
    %4 = vector.broadcast %3 : vector<1x192xf32> to vector<64x192xf32>
    %5 = arith.addf %2, %4 : vector<64x192xf32>
    %c0_5 = arith.constant 0 : index
    %c0_6 = arith.constant 0 : index
    %6 = vector.load %arg5[%c0_5, %c0_6] : memref<64x192xf32, #tpu.memory_space<vmem>>, vector<64x192xf32>
    tpu.vector_store %arg5[%c0_5, %c0_6], %5 {strides = array<i32>} : memref<64x192xf32, #tpu.memory_space<vmem>>, vector<64x192xf32>,
    return
  }
  func.func @transform_0(%arg0: i32, %arg1: i32) -> (i32, i32) {
    %c0_i32 = arith.constant 0 : i32
    %c0_i32_0 = arith.constant 0 : i32
    return %arg0, %c0_i32 : i32, i32
  }
  func.func @transform_1(%arg0: i32, %arg1: i32) -> (i32, i32) {
    %c0_i32 = arith.constant 0 : i32
    %c0_i32_0 = arith.constant 0 : i32
    return %c0_i32, %arg1 : i32, i32
  }
  func.func @transform_2(%arg0: i32, %arg1: i32) -> (i32, i32) {
    %c0_i32 = arith.constant 0 : i32
    %c0_i32_0 = arith.constant 0 : i32
    return %c0_i32, %arg1 : i32, i32
  }
  func.func @transform_3(%arg0: i32, %arg1: i32) -> (i32, i32) {
    %c0_i32 = arith.constant 0 : i32
    return %arg0, %arg1 : i32, i32
  }
}

module attributes {stable_mosaic.version = 11 : i64} {
  func.func @_layernorm_kernel(%arg0: i32, %arg1: memref<64x192xf32, #tpu.memory_space<vmem>>, %arg2: memref<1x192xf32, #tpu.memory_space<vmem>>, %arg3: memref<1x192xf32, #tpu.memory_space<vmem>>, %arg4: memref<64x192xf32, #tpu.memory_space<vmem>>) attributes {dimension_semantics = [#tpu.dimension_semantics<parallel>], iteration_bounds = array<i64: 2>, scalar_prefetch = 0 : i64, scratch_operands = 0 : i64, tpu.core_type = #tpu.core_type<tc>, window_params = [{transform_indices = @transform_0, window_bounds = array<i64: 64, 192>}, {pipeline_mode = #tpu.pipeline_mode<synchronous>, transform_indices = @transform_1, window_bounds = array<i64: 1, 192>}, {pipeline_mode = #tpu.pipeline_mode<synchronous>, transform_indices = @transform_2, window_bounds = array<i64: 1, 192>}, {transform_indices = @transform_3, window_bounds = array<i64: 64, 192>}]} {
    %c0 = arith.constant 0 : index
    %c0_0 = arith.constant 0 : index
    %0 = vector.load %arg1[%c0, %c0_0] : memref<64x192xf32, #tpu.memory_space<vmem>>, vector<64x192xf32>
    %cst = arith.constant dense<0.000000e+00> : vector<64xf32>
    %1 = vector.multi_reduction <add>, %0, %cst [1] : vector<64x192xf32> to vector<64xf32>
    %2 = vector.shape_cast %1 : vector<64xf32> to vector<64x1xf32>
    %cst_1 = arith.constant 1.920000e+02 : f32
    %3 = vector.broadcast %cst_1 : f32 to vector<64x1xf32>
    %4 = arith.divf %2, %3 : vector<64x1xf32>
    %5 = vector.broadcast %4 : vector<64x1xf32> to vector<64x192xf32>
    %6 = arith.subf %0, %5 : vector<64x192xf32>
    %7 = arith.mulf %6, %6 : vector<64x192xf32>
    %cst_2 = arith.constant dense<0.000000e+00> : vector<64xf32>
    %8 = vector.multi_reduction <add>, %7, %cst_2 [1] : vector<64x192xf32> to vector<64xf32>
    %9 = vector.shape_cast %8 : vector<64xf32> to vector<64x1xf32>
    %cst_3 = arith.constant 1.920000e+02 : f32
    %10 = vector.broadcast %cst_3 : f32 to vector<64x1xf32>
    %11 = arith.divf %9, %10 : vector<64x1xf32>
    %cst_4 = arith.constant 9.99999974E-6 : f32
    %12 = vector.broadcast %cst_4 : f32 to vector<64x1xf32>
    %13 = arith.addf %11, %12 : vector<64x1xf32>
    %14 = math.rsqrt %13 : vector<64x1xf32>
    %15 = vector.broadcast %14 : vector<64x1xf32> to vector<64x192xf32>
    %16 = arith.mulf %6, %15 : vector<64x192xf32>
    %c0_5 = arith.constant 0 : index
    %c0_6 = arith.constant 0 : index
    %17 = vector.load %arg2[%c0_5, %c0_6] : memref<1x192xf32, #tpu.memory_space<vmem>>, vector<1x192xf32>
    %18 = vector.broadcast %17 : vector<1x192xf32> to vector<64x192xf32>
    %19 = arith.mulf %16, %18 : vector<64x192xf32>
    %c0_7 = arith.constant 0 : index
    %c0_8 = arith.constant 0 : index
    %20 = vector.load %arg3[%c0_7, %c0_8] : memref<1x192xf32, #tpu.memory_space<vmem>>, vector<1x192xf32>
    %21 = vector.broadcast %20 : vector<1x192xf32> to vector<64x192xf32>
    %22 = arith.addf %19, %21 : vector<64x192xf32>
    %c0_9 = arith.constant 0 : index
    %c0_10 = arith.constant 0 : index
    %23 = vector.load %arg4[%c0_9, %c0_10] : memref<64x192xf32, #tpu.memory_space<vmem>>, vector<64x192xf32>
    tpu.vector_store %arg4[%c0_9, %c0_10], %22 {strides = array<i32>} : memref<64x192xf32, #tpu.memory_space<vmem>>, vector<64x192xf32>,
    return
  }
  func.func @transform_0(%arg0: i32) -> (i32, i32) {
    %c0_i32 = arith.constant 0 : i32
    %c0_i32_0 = arith.constant 0 : i32
    return %arg0, %c0_i32 : i32, i32
  }
  func.func @transform_1(%arg0: i32) -> (i32, i32) {
    %c0_i32 = arith.constant 0 : i32
    %c0_i32_0 = arith.constant 0 : i32
    %c0_i32_1 = arith.constant 0 : i32
    return %c0_i32, %c0_i32_0 : i32, i32
  }
  func.func @transform_2(%arg0: i32) -> (i32, i32) {
    %c0_i32 = arith.constant 0 : i32
    %c0_i32_0 = arith.constant 0 : i32
    %c0_i32_1 = arith.constant 0 : i32
    return %c0_i32, %c0_i32_0 : i32, i32
  }
  func.func @transform_3(%arg0: i32) -> (i32, i32) {
    %c0_i32 = arith.constant 0 : i32
    %c0_i32_0 = arith.constant 0 : i32
    return %arg0, %c0_i32 : i32, i32
  }
}

</mosaic_0001>

<bundles_post_ra>
// kernel: _patch_embed.2
= control target key start
LH: loop header
LB: loop body
LE: loop exit
PB: predicated region body
PF: predicated region fallthrough
CT: control target
= control target key end

     0   :  { %s649_s12 = smov 0   ;;  %s651_s13 = smov 0   ;;  %s733_s0 = inlined_call_operand.vmem [shape: bf16[128,48], index: 0, kind: input, shape index: {}]   ;;  %s734_s1 = inlined_call_operand.vmem [shape: bf16[48,192], index: 1, kind: input, shape index: {}]   ;;  %s735_s2 = inlined_call_operand.vmem [shape: f32[1,192], index: 2, kind: input, shape index: {}]   ;;  %s736_s3 = inlined_call_operand.vmem [shape: f32[128,192], index: 3, kind: output, shape index: {}]  }
   0x1   :  { %s653_s14 = smov 0  }
   0x2 LB: > { %s25_s15 = sadd.s32 1, %s622_s13  ;;  %p537_p0 = scmp.ge.s32.totalorder %s626_s14, 1  ;;  %s626_s14 = sphi %s653_s14, %s13_s14   ;;  %s622_s13 = sphi %s651_s13, %s738_s13   ;;  %s618_s12 = sphi %s649_s12, %s737_s12  }
   0x3   : > { %p27_p1 = scmp.ge.s32.totalorder %s25_s15, 2  ;;  %p173_p2 = scmp.lt.s32.totalorder %s626_s14, 3 }
   0x5   : > { %s740_s15 = smov (%p27_p1, %s25_s15), 0  ;;  %p174_p3 = pnand %p537_p0, %p173_p2 }
   0x6   : > { %v591_v0 = vld [vmem:[%s734_s1 + $0x4] ss:$8 sps:$4 sm:$0xff] (!%p174_p3)   ;;  %s538_s18 = sshll.u32 (!%p174_p3), %s618_s12, 3  ;;  %v593_v1 = vld [vmem:[%s734_s1] ss:$8 sps:$4 sm:$0xff] (!%p174_p3)   ;;  %v628_v2 = vmov (!%p174_p3), 0   ;;  %v257_v11 = vlaneseq (!%p174_p3) }
   0x7   : > { %177 = sbr.rel (%p174_p3) target bundleno = 246 (0xf6), region = 32  ;;  %362 = vmatprep.mubr.bf16.mxu0 (!%p174_p3), %v628_v2  ;;  %382 = vmatprep.mubr.bf16.mxu1 (!%p174_p3), %v628_v2  ;;  %p212_p4 = scmp.lt.s32.totalorder (!%p174_p3), %s538_s18, 15  ;;  %v594_v3 = vld [vmem:[%s734_s1 + $0x14] ss:$8 sps:$4 sm:$0xff] (!%p174_p3)   ;;  %v596_v4 = vld [vmem:[%s734_s1 + $0x10] ss:$8 sps:$4 sm:$0xff] (!%p174_p3)  }
   0x8   : > { %330 = vmatprep.subr.bf16.mxu0 (!%p174_p3), %v591_v0  ;;  %560 = vmatprep.subr.bf16.mxu1 (!%p174_p3), %v591_v0  ;;  %v597_v5 = vld [vmem:[%s734_s1 + $0x24] ss:$8 sps:$4 sm:$0xff] (!%p174_p3)   ;;  %v599_v6 = vld [vmem:[%s734_s1 + $0x20] ss:$8 sps:$4 sm:$0xff] (!%p174_p3)   ;;  %vm317_vm0 = vcmask (!%p174_p3), 392192   ;;  %v258_v12 = vshrl.u32 (!%p174_p3), %v257_v11, 7 }
   0x9   : > { %331 = vmatpush1.bf16.msra.mxu0 (!%p174_p3), %v593_v1  ;;  %563 = vmatpush1.bf16.msra.mxu1 (!%p174_p3), %v593_v1  ;;  %v255_v14 = vld [vmem:[%s735_s2] sm:$0x3] (!%p174_p3)  ;;  %vm404_vm1 = vcmask (!%p174_p3), 523264  }
   0xa   : > { %332 = vmatprep.subr.bf16.mxu0 (!%p174_p3), %v594_v3  ;;  %561 = vmatprep.subr.bf16.mxu1 (!%p174_p3), %v594_v3  ;;  %v259_v13 = vsub.s32 (!%p174_p3), 0, %v258_v12  ;;  %v263_v15 = vsub.s32 (!%p174_p3), 1, %v258_v12 }
   0xc   : > { %v260_v16 = vrot.slane (!%p174_p3), %v255_v14, %v259_v13  ;;  %v264_v17 = vrot.slane (!%p174_p3), %v255_v14, %v263_v15 }
   0xd   : > { %333 = vmatpush1.bf16.msra.mxu0 (!%p174_p3), %v596_v4  ;;  %564 = vmatpush1.bf16.msra.mxu1 (!%p174_p3), %v596_v4 }
   0xe   : > { %s742_s18 = smov (!%p212_p4, %s538_s18), 15  ;;  %334 = vmatprep.subr.bf16.mxu0 %v597_v5  ;;  %562 = vmatprep.subr.bf16.mxu1 %v597_v5 }
   0xf   : > { %s539_s27 = sshll.u32 %s742_s18, 2  ;;  %s559_s8 = sshll.u32 %s742_s18, 4 }
  0x10   : > { %s215_s30 = scalar_lea.vmem %s733_s0, %s539_s27  ;;  %s698_s11 = scalar_lea.vmem %s736_s3, %s559_s8 }
  0x11   : > { %v600_v7 = vld [vmem:[%s215_s30] sm:$0xff]   ;;  %v601_v8 = vld [vmem:[%s215_s30 + $0x10] sm:$0xff]   ;;  %335 = vmatpush1.bf16.msra.mxu0 %v599_v6  ;;  %565 = vmatpush1.bf16.msra.mxu1 %v599_v6  ;;  %v602_v9 = vld [vmem:[%s215_s30 + $0x8] sm:$0xff]  }
  0x12   : > { %v603_v10 = vld [vmem:[%s215_s30 + $0x18] sm:$0xff]  }
  0x14   : > { %553 = vmatmul.mubr.msk.bf16.vlgmr.msra.gmra.mrb[0].mxu0 %vm317_vm0, %v600_v7  ;;  %555 = vmatmul.mubr.msk.bf16.vlgmr.msra.gmra.mrb[0].mxu1 %vm317_vm0, %v601_v8 }
  0x15   : > { %372 = vmatprep.mubr.bf16.mxu0 %v628_v2  ;;  %392 = vmatprep.mubr.bf16.mxu1 %v628_v2 }
  0x1c   : > { %554 = vmatmul.mubr.msk.bf16.gmra.mrb[4].mxu0 %vm317_vm0, %v602_v9  ;;  %556 = vmatmul.mubr.msk.bf16.gmra.mrb[4].mxu1 %vm317_vm0, %v603_v10 }
  0xe7   : > { %v364_v18 = vpop.f32.mrb[0].mxu0  ;;  %v384_v19 = vpop.f32.mrb[0].mxu1 }
  0xe8   : > { %v365_v20 = vadd.f32 %v364_v18, %v260_v16  ;;  %v385_v21 = vadd.f32 %v384_v19, %v260_v16  ;;  %v366_v22 = vpop.f32.mrb[1].mxu0  ;;  %v386_v23 = vpop.f32.mrb[1].mxu1 }
  0xe9   : > { %v367_v24 = vadd.f32 %v366_v22, %v264_v17  ;;  %v387_v25 = vadd.f32 %v386_v23, %v264_v17  ;;  %v368_v26 = vpop.f32.mrb[2].mxu0  ;;  %v388_v27 = vpop.f32.mrb[2].mxu1 }
  0xea   : > { %403 = vst [vmem:[%s698_s11] sm:$0xff] %v365_v20  ;;  %412 = vst [vmem:[%s698_s11 + $0x40] sm:$0xff] %v385_v21  ;;  %v369_v28 = vadd.f32 %v368_v26, %v260_v16  ;;  %v389_v29 = vadd.f32 %v388_v27, %v260_v16  ;;  %v370_v30 = vpop.f32.mrb[3].mxu0  ;;  %v390_v31 = vpop.f32.mrb[3].mxu1 }
  0xeb   : > { %405 = vst.msk [vmem:[%s698_s11 + $0x8] sm:$0xff] %vm404_vm1, %v367_v24  ;;  %413 = vst.msk [vmem:[%s698_s11 + $0x48] sm:$0xff] %vm404_vm1, %v387_v25  ;;  %v371_v32 = vadd.f32 %v370_v30, %v264_v17  ;;  %v391_v33 = vadd.f32 %v390_v31, %v264_v17 }
  0xec   : > { %406 = vst [vmem:[%s698_s11 + $0x10] sm:$0xff] %v369_v28  ;;  %414 = vst [vmem:[%s698_s11 + $0x50] sm:$0xff] %v389_v29 }
  0xed   : > { %407 = vst.msk [vmem:[%s698_s11 + $0x18] sm:$0xff] %vm404_vm1, %v371_v32  ;;  %415 = vst.msk [vmem:[%s698_s11 + $0x58] sm:$0xff] %vm404_vm1, %v391_v33 }
  0xef   : > { %v374_v34 = vpop.f32.mrb[4].mxu0  ;;  %v394_v35 = vpop.f32.mrb[4].mxu1 }
  0xf0   : > { %v375_v36 = vadd.f32 %v374_v34, %v260_v16  ;;  %v395_v37 = vadd.f32 %v394_v35, %v260_v16  ;;  %v376_v38 = vpop.f32.mrb[5].mxu0  ;;  %v396_v39 = vpop.f32.mrb[5].mxu1 }
  0xf1   : > { %v377_v40 = vadd.f32 %v376_v38, %v264_v17  ;;  %v397_v41 = vadd.f32 %v396_v39, %v264_v17  ;;  %v378_v42 = vpop.f32.mrb[6].mxu0  ;;  %v398_v43 = vpop.f32.mrb[6].mxu1 }
  0xf2   : > { %408 = vst [vmem:[%s698_s11 + $0x20] sm:$0xff] %v375_v36  ;;  %416 = vst [vmem:[%s698_s11 + $0x60] sm:$0xff] %v395_v37  ;;  %v379_v44 = vadd.f32 %v378_v42, %v260_v16  ;;  %v399_v45 = vadd.f32 %v398_v43, %v260_v16  ;;  %v380_v46 = vpop.f32.mrb[7].mxu0  ;;  %v400_v47 = vpop.f32.mrb[7].mxu1 }
  0xf3   : > { %409 = vst.msk [vmem:[%s698_s11 + $0x28] sm:$0xff] %vm404_vm1, %v377_v40  ;;  %417 = vst.msk [vmem:[%s698_s11 + $0x68] sm:$0xff] %vm404_vm1, %v397_v41  ;;  %v381_v48 = vadd.f32 %v380_v46, %v264_v17  ;;  %v401_v49 = vadd.f32 %v400_v47, %v264_v17 }
  0xf4   : > { %410 = vst [vmem:[%s698_s11 + $0x30] sm:$0xff] %v379_v44  ;;  %418 = vst [vmem:[%s698_s11 + $0x70] sm:$0xff] %v399_v45 }
  0xf5   : > { %411 = vst.msk [vmem:[%s698_s11 + $0x38] sm:$0xff] %vm404_vm1, %v381_v48  ;;  %419 = vst.msk [vmem:[%s698_s11 + $0x78] sm:$0xff] %vm404_vm1, %v401_v49 }
  0xf6 PF: > { %s13_s14 = sadd.s32 1, %s626_s14   ;;  %s737_s12 = smov %s622_s13 }
  0xf7   : > { %p10_p5 = scmp.ge.s32.totalorder %s13_s14, 4   ;;  %s738_s13 = smov %s740_s15 }
  0xf9   :  { %12 = sbr.rel (!%p10_p5) target bundleno = 2 (0x2), region = 68 }

// kernel: _patch_embed.3
= control target key start
LH: loop header
LB: loop body
LE: loop exit
PB: predicated region body
PF: predicated region fallthrough
CT: control target
= control target key end

     0   :  { %8 = vsyncpa [#allocation3], 0  ;;  %s948_s0 = inlined_call_operand.vmem [shape: f32[128,192], index: 0, kind: input, shape index: {}]   ;;  %s949_s1 = inlined_call_operand.vmem [shape: f32[1,192], index: 1, kind: input, shape index: {}]   ;;  %s950_s2 = inlined_call_operand.vmem [shape: f32[1,192], index: 2, kind: input, shape index: {}]   ;;  %s951_s3 = inlined_call_operand.hbm [shape: f32[128,192], index: 3, kind: output, shape index: {}]  }
   0x1   :  { %10 = vsyncpa [#allocation3 + $0x1], 0  ;;  %s647_s12 = smov 0   ;;  %s649_s13 = smov 0  }
   0x2   :  { %s651_s14 = smov 0   ;;  %s653_s15 = smov 0  }
   0x3 LB: > { %s668_s16 = sadd.s32 4294967295, %s622_s15   ;;  %s486_s17 = sadd.s32 4294967294, %s622_s15   ;;  %s622_s15 = sphi %s653_s15, %s957_s15   ;;  %s618_s14 = sphi %s651_s14, %s956_s14   ;;  %s614_s13 = sphi %s649_s13, %s955_s13   ;;  %s610_s12 = sphi %s647_s12, %s954_s12  }
   0x4   : > { %s672_s18 = sadd.s32 1, %s622_s15   ;;  %s91_s19 = sadd.s32 1, %s618_s14 }
   0x5   : > { %s88_s20 = ssub.s32 %s622_s15, %s672_s18  ;;  %p101_p0 = scmp.ne.s32.totalorder %s618_s14, %s614_s13 }
   0x6   : > { %p89_p1 = scmp.eq.s32.totalorder %s88_s20, 0  ;;  %p102_p2 = scmp.eq.s32.totalorder %s668_s16, 1 }
   0x7   : > { %p107_p3 = scmp.ne.s32.totalorder %s614_s13, %s610_s12  ;;  %p108_p4 = scmp.eq.s32.totalorder %s486_s17, 1 }
   0x8   : > { %s683_s21 = scalar_select %p89_p1, %s618_s14, %s91_s19  }
   0x9   : > { %p685_p5 = por %p102_p2, %p101_p0  ;;  %p689_p6 = por %p108_p4, %p107_p3 }
   0xa   : > { %p489_p7 = scmp.ge.s32.totalorder %s622_s15, 1  ;;  %p142_p8 = scmp.lt.s32.totalorder %s622_s15, 3 }
   0xc   : > { %p143_p9 = pnand %p489_p7, %p142_p8 }
   0xd   : > { %s491_s24 = sshll.u32 (!%p143_p9), %s668_s16, 3  ;;  %vm191_vm0 = vcmask (!%p143_p9), 523264   ;;  %s164_s6 = sand.u32 (!%p143_p9), 1, %s614_s13  }
   0xe   : > { %146 = sbr.rel (%p143_p9) target bundleno = 373 (0x175), region = 32  ;;  %p168_p10 = scmp.lt.s32.totalorder (!%p143_p9), %s491_s24, 15 }
   0xf   : > { %s490_s7 = sshll.u32 (!%p143_p9), %s164_s6, 7  ;;  %s502_s9 = sshll.u32 (!%p143_p9), %s668_s16, 11 }
  0x10   : > { %s832_s8 = scalar_lea.vmem (!%p143_p9), [#allocation2], %s490_s7  ;;  %s896_s16 = scalar_lea.hbm (!%p143_p9), %s951_s3, %s502_s9 }
  0x11   : > { %s424_s10 = sshll.u32 (!%p143_p9), %s832_s8, 4  ;;  %s907_s19 = scalar_lea.sflag (!%p143_p9), [#allocation3], %s164_s6  ;;  %s898_s10 = int_to_ptr.vmem [resolvable:$true] %s424_s10 }
  0x12   : > { %s560_s20 = scalar_lea.vmem (!%p143_p9), %s898_s10, 2048 }
  0x13   : > { %p561_p11 = scmp.ne.s32.totalorder (!%p143_p9), %s898_s10, %s560_s20 }
  0x15   : > { %s959_s24 = smov (!%p168_p10, %s491_s24), 15  ;;  %p562_p12 = pnand %p561_p11, %p685_p5 }
  0x16   : > { %s500_s25 = sshll.u32 %s959_s24, 4  ;;  %s624_s24 = smov [#allocation2]  }
  0x17   : > { %s699_s28 = scalar_lea.vmem %s948_s0, %s500_s25  ;;  %p563_p13 = pneg %p562_p12 }
  0x18   : > { %v175_v0 = vld [vmem:[%s699_s28] sm:$0xff]  ;;  %v176_v1 = vld [vmem:[%s699_s28 + $0x8] sm:$0xff]  ;;  %v177_v5 = vld [vmem:[%s699_s28 + $0x10] sm:$0xff]  ;;  %s564_s25 = sshll.u32 %s624_s24, 4  ;;  %s565_s25 = int_to_ptr.vmem [resolvable:$false] %s564_s25 }
  0x19   : > { %v179_v2 = vld [vmem:[%s699_s28 + $0x20] sm:$0xff]  ;;  %v192_v3 = vsel %vm191_vm0, %v176_v1, 0.0  ;;  %v180_v4 = vld [vmem:[%s699_s28 + $0x28] sm:$0xff]  ;;  %v178_v6 = vld [vmem:[%s699_s28 + $0x18] sm:$0xff]  ;;  %s566_s26 = scalar_lea.vmem %s565_s25, 4096  ;;  %p567_p0 = scmp.lt.s32.totalorder %s898_s10, %s565_s25 }
  0x1a   : > { %v193_v7 = vadd.f32 %v192_v3, %v175_v0  ;;  %v200_v8 = vsel %vm191_vm0, %v180_v4, 0.0  ;;  %v196_v9 = vsel %vm191_vm0, %v178_v6, 0.0  ;;  %v181_v10 = vld [vmem:[%s699_s28 + $0x30] sm:$0xff]  ;;  %v182_v11 = vld [vmem:[%s699_s28 + $0x38] sm:$0xff]  ;;  %v184_v14 = vld [vmem:[%s699_s28 + $0x48] sm:$0xff]  ;;  %p568_p1 = scmp.lt.s32.totalorder %s566_s26, %s560_s20 }
  0x1b   : > { %v201_v12 = vadd.f32 %v200_v8, %v179_v2  ;;  %v204_v13 = vsel %vm191_vm0, %v182_v11, 0.0  ;;  %v186_v15 = vld [vmem:[%s699_s28 + $0x58] sm:$0xff]  ;;  %v197_v16 = vadd.f32 %v196_v9, %v177_v5  ;;  %v183_v18 = vld [vmem:[%s699_s28 + $0x40] sm:$0xff]  ;;  %v208_v19 = vsel %vm191_vm0, %v184_v14, 0.0  ;;  %v185_v20 = vld [vmem:[%s699_s28 + $0x50] sm:$0xff] }
  0x1c   : > { %194 = vadd.xlane.f32.xlu0 %v193_v7  ;;  %v205_v17 = vadd.f32 %v204_v13, %v181_v10  ;;  %v212_v21 = vsel %vm191_vm0, %v186_v15, 0.0  ;;  %v720_v22 = vld [vmem:[%s699_s28 + $0x68] sm:$0xff]  ;;  %v723_v23 = vld [vmem:[%s699_s28 + $0x78] sm:$0xff]  ;;  %v209_v24 = vadd.f32 %v208_v19, %v183_v18  ;;  %v187_v26 = vld [vmem:[%s699_s28 + $0x60] sm:$0xff]  ;;  %p569_p2 = por %p568_p1, %p567_p0 }
  0x1d   : > { %202 = vadd.xlane.f32.xlu1 %v201_v12  ;;  %v213_v25 = vadd.f32 %v212_v21, %v185_v20  ;;  %v216_v27 = vsel %vm191_vm0, %v720_v22, 0.0  ;;  %v189_v28 = vld [vmem:[%s699_s28 + $0x70] sm:$0xff]  ;;  %v220_v29 = vsel %vm191_vm0, %v723_v23, 0.0 }
  0x1e   : > { %v217_v30 = vadd.f32 %v216_v27, %v187_v26  ;;  %v221_v31 = vadd.f32 %v220_v29, %v189_v28  ;;  %p570_p3 = pnand %p569_p2, %p563_p13 }
  0x20   : > { %198 = vadd.xlane.f32.xlu0 %v197_v16 }
  0x21   : > { %206 = vadd.xlane.f32.xlu1 %v205_v17 }
  0x24   : > { %210 = vadd.xlane.f32.xlu0 %v209_v24 }
  0x25   : > { %214 = vadd.xlane.f32.xlu1 %v213_v25 }
  0x28   : > { %218 = vadd.xlane.f32.xlu0 %v217_v30 }
  0x29   : > { %222 = vadd.xlane.f32.xlu1 %v221_v31 }
  0xa9   : > { %v195_v32 = vpop.xlane.xlu0 %194 }
  0xaa   : > { %v225_v33 = vmul.f32 0.0052083335, %v195_v32  ;;  %v203_v34 = vpop.xlane.xlu1 %202 }
  0xab   : > { %v227_v35 = vmul.f32 0.0052083335, %v203_v34  ;;  %v339_v34 = vlaneseq }
  0xac   : > { %v731_v36 = vsub.f32 %v175_v0, %v225_v33  ;;  %v733_v37 = vsub.f32 %v176_v1, %v225_v33 }
  0xad   : > { %v735_v38 = vsub.f32 %v179_v2, %v227_v35  ;;  %v737_v39 = vsub.f32 %v180_v4, %v227_v35  ;;  %v199_v40 = vpop.xlane.xlu0 %198 }
  0xae   : > { %v226_v41 = vmul.f32 0.0052083335, %v199_v40  ;;  %v207_v42 = vpop.xlane.xlu1 %206  ;;  %v249_v43 = vmul.f32 %v731_v36, %v731_v36  ;;  %v250_v44 = vmul.f32 %v733_v37, %v733_v37 }
  0xaf   : > { %v228_v45 = vmul.f32 0.0052083335, %v207_v42  ;;  %v253_v46 = vmul.f32 %v735_v38, %v735_v38  ;;  %v254_v47 = vmul.f32 %v737_v39, %v737_v39 }
  0xb0   : > { %v747_v48 = vsub.f32 %v177_v5, %v226_v41  ;;  %v749_v49 = vsub.f32 %v178_v6, %v226_v41  ;;  %v265_v50 = vsel %vm191_vm0, %v250_v44, 0.0  ;;  %v340_v44 = vshrl.u32 %v339_v34, 7 }
  0xb1   : > { %v752_v51 = vsub.f32 %v181_v10, %v228_v45  ;;  %v754_v52 = vsub.f32 %v182_v11, %v228_v45  ;;  %v211_v53 = vpop.xlane.xlu0 %210  ;;  %v266_v54 = vadd.f32 %v265_v50, %v249_v43  ;;  %v273_v55 = vsel %vm191_vm0, %v254_v47, 0.0 }
  0xb2   : > { %v229_v56 = vmul.f32 0.0052083335, %v211_v53  ;;  %v215_v57 = vpop.xlane.xlu1 %214  ;;  %v251_v58 = vmul.f32 %v747_v48, %v747_v48  ;;  %v252_v59 = vmul.f32 %v749_v49, %v749_v49  ;;  %v274_v61 = vadd.f32 %v273_v55, %v253_v46 }
  0xb3   : > { %267 = vadd.xlane.f32.xlu0 %v266_v54  ;;  %v230_v60 = vmul.f32 0.0052083335, %v215_v57  ;;  %v255_v62 = vmul.f32 %v752_v51, %v752_v51  ;;  %v256_v63 = vmul.f32 %v754_v52, %v754_v52  ;;  %v341_v55 = vsub.s32 0, %v340_v44  ;;  %v337_v57 = vld [vmem:[%s949_s1] sm:$0x3] }
  0xb4   : > { %v765_v0 = vsub.f32 %v183_v18, %v229_v56  ;;  %v767_v1 = vsub.f32 %v184_v14, %v229_v56  ;;  %v269_v2 = vsel %vm191_vm0, %v252_v59, 0.0  ;;  %v345_v56 = vsub.s32 1, %v340_v44 }
  0xb5   : > { %v770_v3 = vsub.f32 %v185_v20, %v230_v60  ;;  %v772_v4 = vsub.f32 %v186_v15, %v230_v60  ;;  %v219_v5 = vpop.xlane.xlu0 %218  ;;  %v270_v6 = vadd.f32 %v269_v2, %v251_v58  ;;  %v277_v7 = vsel %vm191_vm0, %v256_v63, 0.0  ;;  %v365_v60 = vld [vmem:[%s950_s2] sm:$0x3] }
  0xb6   : > { %v231_v8 = vmul.f32 0.0052083335, %v219_v5  ;;  %v223_v9 = vpop.xlane.xlu1 %222  ;;  %v257_v10 = vmul.f32 %v765_v0, %v765_v0  ;;  %v258_v11 = vmul.f32 %v767_v1, %v767_v1  ;;  %v278_v13 = vadd.f32 %v277_v7, %v255_v62 }
  0xb7   : > { %275 = vadd.xlane.f32.xlu0 %v274_v61  ;;  %271 = vadd.xlane.f32.xlu1 %v270_v6  ;;  %v232_v12 = vmul.f32 0.0052083335, %v223_v9  ;;  %v259_v14 = vmul.f32 %v770_v3, %v770_v3  ;;  %v260_v15 = vmul.f32 %v772_v4, %v772_v4  ;;  %v812_v5 = vrot.slane %v337_v57, %v341_v55 }
  0xb8   : > { %v783_v16 = vsub.f32 %v187_v26, %v231_v8  ;;  %v786_v17 = vsub.f32 %v720_v22, %v231_v8  ;;  %v281_v18 = vsel %vm191_vm0, %v258_v11, 0.0  ;;  %v814_v6 = vrot.slane %v337_v57, %v345_v56 }
  0xb9   : > { %v789_v19 = vsub.f32 %v189_v28, %v232_v12  ;;  %v792_v20 = vsub.f32 %v723_v23, %v232_v12  ;;  %v282_v21 = vadd.f32 %v281_v18, %v257_v10  ;;  %v285_v24 = vsel %vm191_vm0, %v260_v15, 0.0 }
  0xba   : > { %v261_v25 = vmul.f32 %v783_v16, %v783_v16  ;;  %v262_v26 = vmul.f32 %v786_v17, %v786_v17  ;;  %v286_v22 = vadd.f32 %v285_v24, %v259_v14  ;;  %v816_v10 = vrot.slane %v365_v60, %v341_v55 }
  0xbb   : > { %279 = vadd.xlane.f32.xlu1 %v278_v13  ;;  %283 = vadd.xlane.f32.xlu0 %v282_v21  ;;  %v263_v27 = vmul.f32 %v789_v19, %v789_v19  ;;  %v264_v28 = vmul.f32 %v792_v20, %v792_v20  ;;  %v818_v11 = vrot.slane %v365_v60, %v345_v56 }
  0xbc   : > { %v289_v23 = vsel %vm191_vm0, %v262_v26, 0.0 }
  0xbd   : > { %v290_v29 = vadd.f32 %v289_v23, %v261_v25  ;;  %v293_v30 = vsel %vm191_vm0, %v264_v28, 0.0 }
  0xbe   : > { %v294_v31 = vadd.f32 %v293_v30, %v263_v27 }
  0xbf   : > { %287 = vadd.xlane.f32.xlu1 %v286_v22  ;;  %291 = vadd.xlane.f32.xlu0 %v290_v29 }
  0xc3   : > { %295 = vadd.xlane.f32.xlu1 %v294_v31 }
 0x140   : > { %v268_v32 = vpop.xlane.xlu0 %267 }
 0x141   : > { %v297_v33 = vmul.f32 0.0052083335, %v268_v32 }
 0x143   : > { %v305_v35 = vadd.f32 1e-05, %v297_v33 }
 0x144   : > { %v272_v40 = vpop.xlane.xlu1 %271  ;;  %v276_v41 = vpop.xlane.xlu0 %275 }
 0x145   : > { %544 = vrsqrt.f32 %v305_v35  ;;  %v298_v42 = vmul.f32 0.0052083335, %v272_v40  ;;  %v299_v43 = vmul.f32 0.0052083335, %v276_v41 }
 0x147   : > { %v306_v45 = vadd.f32 1e-05, %v298_v42  ;;  %v307_v46 = vadd.f32 1e-05, %v299_v43 }
 0x148   : > { %v280_v47 = vpop.xlane.xlu1 %279  ;;  %v284_v50 = vpop.xlane.xlu0 %283 }
 0x149   : > { %546 = vrsqrt.f32 %v306_v45  ;;  %v300_v53 = vmul.f32 0.0052083335, %v280_v47  ;;  %v301_v54 = vmul.f32 0.0052083335, %v284_v50 }
 0x14a   : > { %548 = vrsqrt.f32 %v307_v46 }
 0x14b   : > { %v308_v58 = vadd.f32 1e-05, %v300_v53  ;;  %v309_v59 = vadd.f32 1e-05, %v301_v54 }
 0x14c   : > { %v288_v61 = vpop.xlane.xlu1 %287  ;;  %v292_v62 = vpop.xlane.xlu0 %291 }
 0x14d   : > { %550 = vrsqrt.f32 %v308_v58  ;;  %v302_v63 = vmul.f32 0.0052083335, %v288_v61  ;;  %v303_v2 = vmul.f32 0.0052083335, %v292_v62 }
 0x14e   : > { %552 = vrsqrt.f32 %v309_v59 }
 0x14f   : > { %v545_v7 = vpop.eup %544  ;;  %v310_v8 = vadd.f32 1e-05, %v302_v63  ;;  %v311_v9 = vadd.f32 1e-05, %v303_v2 }
 0x150   : > { %v321_v12 = vmul.f32 %v545_v7, %v731_v36  ;;  %v322_v13 = vmul.f32 %v545_v7, %v733_v37  ;;  %v296_v14 = vpop.xlane.xlu1 %295 }
 0x151   : > { %554 = vrsqrt.f32 %v310_v8  ;;  %v304_v15 = vmul.f32 0.0052083335, %v296_v14 }
 0x152   : > { %v349_v18 = vmul.f32 %v812_v5, %v321_v12  ;;  %v350_v21 = vmul.f32 %v814_v6, %v322_v13  ;;  %556 = vrsqrt.f32 %v311_v9 }
 0x153   : > { %v547_v24 = vpop.eup %546  ;;  %v312_v25 = vadd.f32 1e-05, %v304_v15 }
 0x154   : > { %v549_v26 = vpop.eup %548  ;;  %v377_v22 = vadd.f32 %v816_v10, %v349_v18  ;;  %v378_v27 = vadd.f32 %v818_v11, %v350_v21  ;;  %v323_v28 = vmul.f32 %v547_v24, %v747_v48  ;;  %v324_v36 = vmul.f32 %v547_v24, %v749_v49 }
 0x155   : > { %v325_v37 = vmul.f32 %v549_v26, %v735_v38  ;;  %v326_v23 = vmul.f32 %v549_v26, %v737_v39  ;;  %558 = vrsqrt.f32 %v312_v25 }
 0x156   : > { %393 = vst [vmem:[%s832_s8] sm:$0xff] %v377_v22  ;;  %394 = vst.msk [vmem:[%s832_s8 + $0x8] sm:$0xff] %vm191_vm0, %v378_v27  ;;  %v351_v29 = vmul.f32 %v812_v5, %v323_v28  ;;  %v352_v48 = vmul.f32 %v814_v6, %v324_v36 }
 0x157   : > { %v551_v30 = vpop.eup %550  ;;  %v353_v49 = vmul.f32 %v812_v5, %v325_v37  ;;  %v354_v38 = vmul.f32 %v814_v6, %v326_v23 }
 0x158   : > { %v553_v39 = vpop.eup %552  ;;  %v379_v31 = vadd.f32 %v816_v10, %v351_v29  ;;  %v380_v32 = vadd.f32 %v818_v11, %v352_v48  ;;  %v327_v33 = vmul.f32 %v551_v30, %v752_v51  ;;  %v328_v34 = vmul.f32 %v551_v30, %v754_v52 }
 0x159   : > { %v381_v35 = vadd.f32 %v816_v10, %v353_v49  ;;  %v382_v40 = vadd.f32 %v818_v11, %v354_v38  ;;  %v329_v41 = vmul.f32 %v553_v39, %v765_v0  ;;  %v330_v42 = vmul.f32 %v553_v39, %v767_v1 }
 0x15a   : > { %395 = vst [vmem:[%s832_s8 + $0x10] sm:$0xff] %v379_v31  ;;  %396 = vst.msk [vmem:[%s832_s8 + $0x18] sm:$0xff] %vm191_vm0, %v380_v32  ;;  %v355_v43 = vmul.f32 %v812_v5, %v327_v33  ;;  %v356_v44 = vmul.f32 %v814_v6, %v328_v34 }
 0x15b   : > { %v555_v51 = vpop.eup %554  ;;  %397 = vst [vmem:[%s832_s8 + $0x20] sm:$0xff] %v381_v35  ;;  %398 = vst.msk [vmem:[%s832_s8 + $0x28] sm:$0xff] %vm191_vm0, %v382_v40  ;;  %v357_v52 = vmul.f32 %v812_v5, %v329_v41  ;;  %v358_v0 = vmul.f32 %v814_v6, %v330_v42 }
 0x15c   : > { %v557_v1 = vpop.eup %556  ;;  %v383_v45 = vadd.f32 %v816_v10, %v355_v43  ;;  %v384_v46 = vadd.f32 %v818_v11, %v356_v44  ;;  %v331_v47 = vmul.f32 %v555_v51, %v770_v3  ;;  %v332_v50 = vmul.f32 %v555_v51, %v772_v4 }
 0x15d   : > { %v385_v53 = vadd.f32 %v816_v10, %v357_v52  ;;  %v386_v54 = vadd.f32 %v818_v11, %v358_v0  ;;  %v333_v55 = vmul.f32 %v557_v1, %v783_v16  ;;  %v334_v56 = vmul.f32 %v557_v1, %v786_v17 }
 0x15e   : > { %399 = vst [vmem:[%s832_s8 + $0x30] sm:$0xff] %v383_v45  ;;  %400 = vst.msk [vmem:[%s832_s8 + $0x38] sm:$0xff] %vm191_vm0, %v384_v46  ;;  %v359_v57 = vmul.f32 %v812_v5, %v331_v47  ;;  %v360_v3 = vmul.f32 %v814_v6, %v332_v50 }
 0x15f   : > { %v559_v4 = vpop.eup %558  ;;  %401 = vst [vmem:[%s832_s8 + $0x40] sm:$0xff] %v385_v53  ;;  %402 = vst.msk [vmem:[%s832_s8 + $0x48] sm:$0xff] %vm191_vm0, %v386_v54  ;;  %v361_v16 = vmul.f32 %v812_v5, %v333_v55  ;;  %v362_v58 = vmul.f32 %v814_v6, %v334_v56 }
 0x160   : > { %v387_v17 = vadd.f32 %v816_v10, %v359_v57  ;;  %v388_v59 = vadd.f32 %v818_v11, %v360_v3  ;;  %v335_v60 = vmul.f32 %v559_v4, %v789_v19  ;;  %v336_v61 = vmul.f32 %v559_v4, %v792_v20 }
 0x161   : > { %v389_v62 = vadd.f32 %v816_v10, %v361_v16  ;;  %v390_v63 = vadd.f32 %v818_v11, %v362_v58 }
 0x162   : > { %403 = vst [vmem:[%s832_s8 + $0x50] sm:$0xff] %v387_v17  ;;  %404 = vst.msk [vmem:[%s832_s8 + $0x58] sm:$0xff] %vm191_vm0, %v388_v59  ;;  %v363_v2 = vmul.f32 %v812_v5, %v335_v60  ;;  %v364_v7 = vmul.f32 %v814_v6, %v336_v61 }
 0x163   : > { %405 = vst [vmem:[%s832_s8 + $0x60] sm:$0xff] %v389_v62  ;;  %406 = vst.msk [vmem:[%s832_s8 + $0x68] sm:$0xff] %vm191_vm0, %v390_v63 }
 0x164   : > { %v391_v19 = vadd.f32 %v816_v10, %v363_v2  ;;  %v392_v20 = vadd.f32 %v818_v11, %v364_v7 }
 0x166   : > { %407 = vst [vmem:[%s832_s8 + $0x70] sm:$0xff] %v391_v19  ;;  %408 = vst.msk [vmem:[%s832_s8 + $0x78] sm:$0xff] %vm191_vm0, %v392_v20 }
 0x167   : > { %573 = shalt.err (!%p570_p3)
}
 0x168   : > { %s574_s27 = scalar_lea.hbm %s896_s16, 2048  ;;  %s578_s30 = scalar_lea.hbm %s951_s3, 4096 }
 0x169   : > { %p575_p4 = scmp.ne.s32.totalorder %s896_s16, %s574_s27  ;;  %p579_p9 = scmp.lt.u32.totalorder %s896_s16, %s951_s3 }
 0x16a   : > { %p580_p10 = scmp.lt.u32.totalorder %s578_s30, %s574_s27  ;;  %p582_p12 = scmp.lt.u32.totalorder %s574_s27, %s896_s16 }
 0x16b   : > { %p576_p7 = pnand %p575_p4, %p685_p5 }
 0x16c   : > { %p581_p11 = por %p580_p10, %p579_p9 }
 0x16d   : > { %p577_p8 = pneg %p576_p7 }
 0x16e   : > { %p583_p13 = por %p582_p12, %p581_p11 }
 0x170   : > { %p584_p0 = pnand %p583_p13, %p577_p8 }
 0x172   : > { %587 = shalt.err (!%p584_p0)
}
 0x173   : > { %s625_s6 = smov 256   ;;  %s626_s7 = smov 16  }
 0x174   : > { %503 = dma.vmem_to_hbm [thread:$0]  (%p685_p5), %s898_s10, 2048, %s896_s16, %s907_s19, %s625_s6, %s625_s6, %s626_s7  }
 0x175 PF: > { %p509_p1 = scmp.ge.s32.totalorder %s622_s15, 2  ;;  %s439_s8 = sand.u32 1, %s610_s12  }
 0x176   : > { %s440_s9 = scalar_lea.sflag [#allocation3], %s439_s8 }
 0x177   : > { %p506_p2 = pnand %p509_p1, %p689_p6 }
 0x179   : > { %605 = dma.done.wait (!%p506_p2), %s440_s9, 2048  }
 0x17a   : > { %607 = vsyncadd (!%p506_p2), %s440_s9, 4294965248  ;;  %p13_p3 = scmp.ge.s32.totalorder %s672_s18, 4   ;;  %s954_s12 = smov %s614_s13 }
 0x17b   : > { %s955_s13 = smov %s618_s14  ;;  %s956_s14 = smov %s683_s21 }
 0x17c   : > { %s957_s15 = smov %s672_s18  ;;  %15 = sbr.rel (!%p13_p3) target bundleno = 3 (0x3), region = 67 }
 0x183   :  { %445 = vsyncpa [#allocation3], 1 }
 0x184   :  { %447 = vsyncpa [#allocation3 + $0x1], 1 }

</bundles_post_ra>
